<compile_context>
chip_gen: v7x
topology: tpu7x:2x2x1
jax: 0.10.0
libtpu: 0.0.40
codegen_flags: <defaults>
</compile_context>

<pallas_src>
import functools

import jax
import jax.numpy as jnp
from jax.experimental import pallas as pl
from jax.experimental.pallas import tpu as pltpu

IN_FEATURES = 3
HIDDEN = 100
LANE = 128


def actor_net_kernel(xT_ref, w1T_ref, b1_ref, whT_ref, bh_ref, out_ref):
    # xT_ref: [3, TILE_B]  (batch on the lane dimension -> lane-dense)
    xT = xT_ref[...]
    # Hidden layer: relu(W1^T @ x^T + b1)  -> [100, TILE_B]
    h = jnp.dot(w1T_ref[...], xT, preferred_element_type=jnp.float32) + b1_ref[...]
    h = jnp.maximum(h, 0.0)
    # Fused heads: single [2,100] @ [100,TILE_B] matmul -> [2, TILE_B]
    z = jnp.dot(whT_ref[...], h, preferred_element_type=jnp.float32) + bh_ref[...]
    # Row 0 -> mu = 2*tanh(z0); row 1 -> sigma = softplus(z1) = logaddexp(z1, 0).
    # Both transcendental branches run on all elements, but EUP has its own VLIW slot
    # and is free filler here (per review: leave fused).
    row = jax.lax.broadcasted_iota(jnp.int32, z.shape, 0)
    out_ref[...] = jnp.where(row == 0, 2.0 * jnp.tanh(z), jnp.logaddexp(z, 0.0))


def _round_up(n, m):
    return ((n + m - 1) // m) * m


def prepare_params(params):
    """Precompute kernel-layout weights once (hoisted out of the per-call forward path)."""
    w1, b1, wmu, bmu, wsig, bsig = params
    w1T = jnp.asarray(w1.T, jnp.float32)                                    # [100, 3]
    b1c = jnp.asarray(b1, jnp.float32).reshape(HIDDEN, 1)                   # [100, 1]
    whT = jnp.asarray(jnp.concatenate([wmu, wsig], axis=1).T, jnp.float32)  # [2, 100]
    bhc = jnp.asarray(jnp.concatenate([bmu, bsig], axis=1), jnp.float32).reshape(2, 1)  # [2, 1]
    return (w1T, b1c, whT, bhc)


@functools.partial(jax.jit, static_argnames=("tile_b",))
def actor_net_forward(x, prepared, tile_b=16384):
    """x: [B, 3] f32. prepared = prepare_params(params).
    Returns (mu [B,1], sigma [B,1]) -- same semantics as the PyTorch module."""
    w1T, b1c, whT, bhc = prepared
    B = x.shape[0]

    # ---- batch-tile selection (always a multiple of 128) ----
    tile_cap = max(_round_up(tile_b, LANE), LANE)      # cap kept <=16K by default: fits
    b128 = _round_up(max(B, 1), LANE)                  # v5e's 16 MiB scoped VMEM.
    if b128 <= LANE:
        tile = LANE                                    # tiny batch: one grid step
    elif b128 <= 2 * tile_cap:
        # Two grid steps: v7x shards them across both TensorCores; on single-TC
        # v5e/v6e the extra step costs only ~0.35 us.
        tile = _round_up(pl.cdiv(b128, 2), LANE)
    else:
        tile = tile_cap                                # huge batch: stream tile_b chunks
    b_pad = _round_up(b128, tile)
    grid = (b_pad // tile,)

    # ---- cheap caller-side layout prep: transpose + pad only ----
    xT = x.T.astype(jnp.float32)                       # [3, B]
    if b_pad > B:
        xT = jnp.pad(xT, ((0, 0), (0, b_pad - B)))     # [3, b_pad]

    flops = 2 * b_pad * (IN_FEATURES * HIDDEN + HIDDEN * 2)
    transcendentals = 6 * b_pad  # tanh + exp + log evaluated on both output rows
    bytes_accessed = 4 * (xT.size + w1T.size + b1c.size + whT.size + bhc.size + 2 * b_pad)

    out = pl.pallas_call(
        actor_net_kernel,
        out_shape=jax.ShapeDtypeStruct((2, b_pad), jnp.float32),
        grid=grid,
        in_specs=[
            pl.BlockSpec((IN_FEATURES, tile), lambda i: (0, i)),    # x^T: streamed over batch
            pl.BlockSpec((HIDDEN, IN_FEATURES), lambda i: (0, 0)),  # W1^T: VMEM-resident
            pl.BlockSpec((HIDDEN, 1), lambda i: (0, 0)),            # b1 column
            pl.BlockSpec((2, HIDDEN), lambda i: (0, 0)),            # fused head weights
            pl.BlockSpec((2, 1), lambda i: (0, 0)),                 # fused head bias
        ],
        out_specs=pl.BlockSpec((2, tile), lambda i: (0, i)),        # fused [2, B] output
        compiler_params=pltpu.CompilerParams(
            dimension_semantics=("parallel",)),                     # v7x: both TCs
        cost_estimate=pl.CostEstimate(
            flops=flops, transcendentals=transcendentals, bytes_accessed=bytes_accessed),
    )(xT, w1T, b1c, whT, bhc)

    mu = out[0, :B].reshape(B, 1)
    sigma = out[1, :B].reshape(B, 1)
    return mu, sigma


def init_params(key):
    # Deterministic init mimicking PyTorch Linear default U(-1/sqrt(fan_in), 1/sqrt(fan_in)).
    k1, k2, k3, k4, k5, k6 = jax.random.split(key, 6)

    def u(k, shape, fan_in):
        bound = 1.0 / jnp.sqrt(fan_in)
        return jax.random.uniform(k, shape, jnp.float32, -bound, bound)

    w1 = u(k1, (3, 100), 3.0)        # fc:       [in=3, out=100]
    b1 = u(k2, (1, 100), 3.0)
    wmu = u(k3, (100, 1), 100.0)     # mu_head:  [in=100, out=1]
    bmu = u(k4, (1, 1), 100.0)
    wsig = u(k5, (100, 1), 100.0)    # sigma_head
    bsig = u(k6, (1, 1), 100.0)
    return (w1, b1, wmu, bmu, wsig, bsig)


def reference_forward(x, params):
    w1, b1, wmu, bmu, wsig, bsig = params
    h = jax.nn.relu(x @ w1 + b1)
    mu = 2.0 * jnp.tanh(h @ wmu + bmu)
    sigma = jax.nn.softplus(h @ wsig + bsig)
    return mu, sigma


if __name__ == "__main__":
    key = jax.random.PRNGKey(0)
    pkey, xkey = jax.random.split(key)
    params = init_params(pkey)
    prepared = prepare_params(params)   # one-time weight re-layout (not per forward call)

    B = 8
    x = jax.random.normal(xkey, (B, 3), dtype=jnp.float32)   # ActorNet expects 3 input features

    mu, sigma = actor_net_forward(x, prepared)
    jax.block_until_ready((mu, sigma))

    mu_ref, sigma_ref = reference_forward(x, params)
    assert mu.shape == (B, 1) and sigma.shape == (B, 1)
    assert jnp.allclose(mu, mu_ref, atol=1e-5), "mu mismatch"
    assert jnp.allclose(sigma, sigma_ref, atol=1e-5), "sigma mismatch"

    print("KERNEL_OK")
</pallas_src>

<mosaic_0001>
module attributes {stable_mosaic.version = 11 : i64} {
  func.func @actor_net_kernel(%arg0: i32, %arg1: memref<3x128xf32, #tpu.memory_space<vmem>>, %arg2: memref<100x3xf32, #tpu.memory_space<vmem>>, %arg3: memref<100x1xf32, #tpu.memory_space<vmem>>, %arg4: memref<2x100xf32, #tpu.memory_space<vmem>>, %arg5: memref<2x1xf32, #tpu.memory_space<vmem>>, %arg6: memref<2x128xf32, #tpu.memory_space<vmem>>) attributes {dimension_semantics = [#tpu.dimension_semantics<parallel>], iteration_bounds = array<i64: 1>, scalar_prefetch = 0 : i64, scratch_operands = 0 : i64, tpu.core_type = #tpu.core_type<tc>, window_params = [{transform_indices = @transform_0, window_bounds = array<i64: 3, 128>}, {pipeline_mode = #tpu.pipeline_mode<synchronous>, transform_indices = @transform_1, window_bounds = array<i64: 100, 3>}, {pipeline_mode = #tpu.pipeline_mode<synchronous>, transform_indices = @transform_2, window_bounds = array<i64: 100, 1>}, {pipeline_mode = #tpu.pipeline_mode<synchronous>, transform_indices = @transform_3, window_bounds = array<i64: 2, 100>}, {pipeline_mode = #tpu.pipeline_mode<synchronous>, transform_indices = @transform_4, window_bounds = array<i64: 2, 1>}, {transform_indices = @transform_5, window_bounds = array<i64: 2, 128>}]} {
    %c0 = arith.constant 0 : index
    %c0_0 = arith.constant 0 : index
    %0 = vector.load %arg1[%c0, %c0_0] : memref<3x128xf32, #tpu.memory_space<vmem>>, vector<3x128xf32>
    %c0_1 = arith.constant 0 : index
    %c0_2 = arith.constant 0 : index
    %1 = vector.load %arg2[%c0_1, %c0_2] : memref<100x3xf32, #tpu.memory_space<vmem>>, vector<100x3xf32>
    %cst = arith.constant dense<0.000000e+00> : vector<100x128xf32>
    %2 = tpu.matmul %1, %0, %cst {dimension_numbers = #tpu.dot_dimension_numbers<[1], [0], [0], [1], [0, 0, 1, 1], [], []>} : vector<100x3xf32>, vector<3x128xf32>, vector<100x128xf32> -> vector<100x128xf32>
    %c0_3 = arith.constant 0 : index
    %c0_4 = arith.constant 0 : index
    %3 = vector.load %arg3[%c0_3, %c0_4] : memref<100x1xf32, #tpu.memory_space<vmem>>, vector<100x1xf32>
    %4 = vector.broadcast %3 : vector<100x1xf32> to vector<100x128xf32>
    %5 = arith.addf %2, %4 : vector<100x128xf32>
    %cst_5 = arith.constant 0.000000e+00 : f32
    %6 = vector.broadcast %cst_5 : f32 to vector<100x128xf32>
    %7 = arith.maximumf %5, %6 : vector<100x128xf32>
    %c0_6 = arith.constant 0 : index
    %c0_7 = arith.constant 0 : index
    %8 = vector.load %arg4[%c0_6, %c0_7] : memref<2x100xf32, #tpu.memory_space<vmem>>, vector<2x100xf32>
    %cst_8 = arith.constant dense<0.000000e+00> : vector<2x128xf32>
    %9 = tpu.matmul %8, %7, %cst_8 {dimension_numbers = #tpu.dot_dimension_numbers<[1], [0], [0], [1], [0, 0, 1, 1], [], []>} : vector<2x100xf32>, vector<100x128xf32>, vector<2x128xf32> -> vector<2x128xf32>
    %c0_9 = arith.constant 0 : index
    %c0_10 = arith.constant 0 : index
    %10 = vector.load %arg5[%c0_9, %c0_10] : memref<2x1xf32, #tpu.memory_space<vmem>>, vector<2x1xf32>
    %11 = vector.broadcast %10 : vector<2x1xf32> to vector<2x128xf32>
    %12 = arith.addf %9, %11 : vector<2x128xf32>
    %13 = tpu.iota {dimensions = array<i32: 0>} : vector<2x128xi32>
    %c0_i32 = arith.constant 0 : i32
    %14 = vector.broadcast %c0_i32 : i32 to vector<2x128xi32>
    %15 = arith.cmpi eq, %13, %14 : vector<2x128xi32>
    %16 = math.tanh %12 : vector<2x128xf32>
    %cst_11 = arith.constant 2.000000e+00 : f32
    %17 = vector.broadcast %cst_11 : f32 to vector<2x128xf32>
    %18 = arith.mulf %17, %16 : vector<2x128xf32>
    %cst_12 = arith.constant 0.000000e+00 : f32
    %19 = vector.broadcast %cst_12 : f32 to vector<2x128xf32>
    %20 = arith.maximumf %12, %19 : vector<2x128xf32>
    %21 = vector.broadcast %cst_12 : f32 to vector<2x128xf32>
    %22 = arith.subf %12, %21 : vector<2x128xf32>
    %23 = arith.cmpf one, %22, %22 : vector<2x128xf32>
    %24 = vector.broadcast %cst_12 : f32 to vector<2x128xf32>
    %25 = arith.addf %12, %24 : vector<2x128xf32>
    %26 = math.absf %22 : vector<2x128xf32>
    %cst_13 = arith.constant 0.000000e+00 : f32
    %27 = vector.broadcast %cst_13 : f32 to vector<2x128xf32>
    %28 = arith.subf %27, %26 : vector<2x128xf32>
    %29 = math.exp %28 : vector<2x128xf32>
    %30 = math.log1p %29 : vector<2x128xf32>
    %31 = arith.addf %20, %30 : vector<2x128xf32>
    %32 = arith.select %23, %25, %31 : vector<2x128xi1>, vector<2x128xf32>
    %33 = arith.select %15, %18, %32 : vector<2x128xi1>, vector<2x128xf32>
    %c0_14 = arith.constant 0 : index
    %c0_15 = arith.constant 0 : index
    %34 = vector.load %arg6[%c0_14, %c0_15] : memref<2x128xf32, #tpu.memory_space<vmem>>, vector<2x128xf32>
    tpu.vector_store %arg6[%c0_14, %c0_15], %33 {strides = array<i32>} : memref<2x128xf32, #tpu.memory_space<vmem>>, vector<2x128xf32>,
    return
  }
  func.func @transform_0(%arg0: i32) -> (i32, i32) {
    %c0_i32 = arith.constant 0 : i32
    %c0_i32_0 = arith.constant 0 : i32
    return %c0_i32, %arg0 : i32, i32
  }
  func.func @transform_1(%arg0: i32) -> (i32, i32) {
    %c0_i32 = arith.constant 0 : i32
    %c0_i32_0 = arith.constant 0 : i32
    %c0_i32_1 = arith.constant 0 : i32
    return %c0_i32, %c0_i32_0 : i32, i32
  }
  func.func @transform_2(%arg0: i32) -> (i32, i32) {
    %c0_i32 = arith.constant 0 : i32
    %c0_i32_0 = arith.constant 0 : i32
    %c0_i32_1 = arith.constant 0 : i32
    return %c0_i32, %c0_i32_0 : i32, i32
  }
  func.func @transform_3(%arg0: i32) -> (i32, i32) {
    %c0_i32 = arith.constant 0 : i32
    %c0_i32_0 = arith.constant 0 : i32
    %c0_i32_1 = arith.constant 0 : i32
    return %c0_i32, %c0_i32_0 : i32, i32
  }
  func.func @transform_4(%arg0: i32) -> (i32, i32) {
    %c0_i32 = arith.constant 0 : i32
    %c0_i32_0 = arith.constant 0 : i32
    %c0_i32_1 = arith.constant 0 : i32
    return %c0_i32, %c0_i32_0 : i32, i32
  }
  func.func @transform_5(%arg0: i32) -> (i32, i32) {
    %c0_i32 = arith.constant 0 : i32
    %c0_i32_0 = arith.constant 0 : i32
    return %c0_i32, %arg0 : i32, i32
  }
}

</mosaic_0001>

<bundles_post_ra>
// kernel: actor_net_forward.1
= control target key start
LH: loop header
LB: loop body
LE: loop exit
PB: predicated region body
PF: predicated region fallthrough
CT: control target
= control target key end

     0   :  { %vm152_vm0 = vcmask 1042432   ;;  %vm112_vm1 = vcmask 23552   ;;  %v557_v0 = vmov 0.0   ;;  %vm558_vm2 = vmmov 0   ;;  %s730_s0 = inlined_call_operand.vmem [shape: f32[3,128], index: 0, kind: input, shape index: {}]   ;;  %s731_s1 = inlined_call_operand.vmem [shape: f32[100,3], index: 1, kind: input, shape index: {}]   ;;  %s732_s2 = inlined_call_operand.vmem [shape: f32[100,1], index: 2, kind: input, shape index: {}]   ;;  %s733_s4 = inlined_call_operand.vmem [shape: f32[2,1], index: 4, kind: input, shape index: {}]   ;;  %s734_s3 = inlined_call_operand.vmem [shape: f32[2,100], index: 3, kind: input, shape index: {}]   ;;  %s735_s5 = inlined_call_operand.vmem [shape: f32[2,128], index: 5, kind: output, shape index: {}]  }
   0x1   :  { %457 = vmatprep.subr.mxu0 %v557_v0  ;;  %v20_v1 = vld [vmem:[%s730_s0] sm:$0x7]  ;;  %459 = vmatprep.mubr.msk.f32.mxu0 %vm558_vm2, %v557_v0  ;;  %v559_v3 = vmov 0   ;;  %v22_v4 = vld [vmem:[%s731_s1 + $0x8] sm:$0xff]  ;;  %v36_v6 = vld [vmem:[%s732_s2 + $0x10] sm:$0xff]  ;;  %v560_v30 = vmov 0.0|0.0  }
   0x2   :  { %v21_v2 = vld [vmem:[%s731_s1] sm:$0xff]  ;;  %458 = vmatpush3.msk.msra.mxu0 %vm152_vm0, %v20_v1  ;;  %549 = vset.pattern.permute.xlu0 %v559_v3  ;;  %v35_v7 = vld [vmem:[%s732_s2 + $0x8] sm:$0xff]  ;;  %v23_v8 = vld [vmem:[%s731_s1 + $0x10] sm:$0xff]  ;;  %vm310_vm3 = vcmask 1043456   ;;  %vm306_vm4 = vcmask 818176  }
   0x3   :  { %460 = vmatmul.mubr.msk.f32.vlgmr.msra.gmra.mrb[0].mxu0 %vm112_vm1, %v21_v2  ;;  %550 = vset.pattern.permute.xlu1 %v559_v3  ;;  %v34_v5 = vld [vmem:[%s732_s2] sm:$0xff]  ;;  %v37_v9 = vld [vmem:[%s732_s2 + $0x18] sm:$0xff]  ;;  %v39_v12 = vld [vmem:[%s732_s2 + $0x28] sm:$0xff] }
   0x4   :  { %462 = vmatprep.mubr.msk.f32.mxu0 %vm558_vm2, %v557_v0  ;;  %524 = vmatprep.mubr.msk.f32.mxu1 %vm558_vm2, %v557_v0  ;;  %v38_v10 = vld [vmem:[%s732_s2 + $0x20] sm:$0xff]  ;;  %v24_v11 = vld [vmem:[%s731_s1 + $0x18] sm:$0xff]  ;;  %v40_v13 = vld [vmem:[%s732_s2 + $0x30] sm:$0xff] }
   0x5   :  { %49 = vperm.xlu0 %549, %v34_v5   ;;  %59 = vperm.xlu1 %550, %v36_v6   ;;  %v25_v14 = vld [vmem:[%s731_s1 + $0x20] sm:$0xff]  ;;  %v41_v15 = vld [vmem:[%s732_s2 + $0x38] sm:$0xff]  ;;  %v26_v17 = vld [vmem:[%s731_s1 + $0x28] sm:$0xff] }
   0x6   :  { %v42_v16 = vld [vmem:[%s732_s2 + $0x40] sm:$0xff]  ;;  %v43_v18 = vld [vmem:[%s732_s2 + $0x48] sm:$0xff]  ;;  %v44_v19 = vld [vmem:[%s732_s2 + $0x50] sm:$0xff]  ;;  %527 = vmatprep.subr.bf16.mxu1 %v560_v30 }
   0x7   :  { %463 = vmatmul.mubr.msk.f32.gmra.mrb[2].mxu0 %vm112_vm1, %v22_v4  ;;  %v27_v20 = vld [vmem:[%s731_s1 + $0x30] sm:$0xff]  ;;  %v45_v21 = vld [vmem:[%s732_s2 + $0x58] sm:$0xff]  ;;  %v46_v22 = vld [vmem:[%s732_s2 + $0x60] sm:$0xf] }
   0x8   :  { %465 = vmatprep.mubr.msk.f32.mxu0 %vm558_vm2, %v557_v0  ;;  %v28_v23 = vld [vmem:[%s731_s1 + $0x38] sm:$0xff]  ;;  %v300_v24 = vld [vmem:[%s733_s4] sm:$0x3]  ;;  %v30_v26 = vld [vmem:[%s731_s1 + $0x48] sm:$0xff] }
   0x9   :  { %54 = vperm.xlu0 %549, %v35_v7   ;;  %64 = vperm.xlu1 %550, %v37_v9   ;;  %v29_v25 = vld [vmem:[%s731_s1 + $0x40] sm:$0xff]  ;;  %v31_v27 = vld [vmem:[%s731_s1 + $0x50] sm:$0xff]  ;;  %v32_v28 = vld [vmem:[%s731_s1 + $0x58] sm:$0xff] }
   0xa   :  { %v33_v29 = vld [vmem:[%s731_s1 + $0x60] sm:$0xf] }
   0xb   :  { %466 = vmatmul.mubr.msk.f32.gmra.mrb[4].mxu0 %vm112_vm1, %v23_v8 }
   0xc   :  { %468 = vmatprep.mubr.msk.f32.mxu0 %vm558_vm2, %v557_v0 }
   0xd   :  { %69 = vperm.xlu0 %549, %v38_v10   ;;  %74 = vperm.xlu1 %550, %v39_v12  }
   0xf   :  { %469 = vmatmul.mubr.msk.f32.gmra.mrb[6].mxu0 %vm112_vm1, %v24_v11 }
  0x10   :  { %471 = vmatprep.mubr.msk.f32.mxu0 %vm558_vm2, %v557_v0 }
  0x11   :  { %79 = vperm.xlu0 %549, %v40_v13   ;;  %84 = vperm.xlu1 %550, %v41_v15  }
  0x13   :  { %472 = vmatmul.mubr.msk.f32.gmra.mrb[8].mxu0 %vm112_vm1, %v25_v14 }
  0x14   :  { %474 = vmatprep.mubr.msk.f32.mxu0 %vm558_vm2, %v557_v0 }
  0x15   :  { %89 = vperm.xlu0 %549, %v42_v16   ;;  %94 = vperm.xlu1 %550, %v43_v18  }
  0x17   :  { %475 = vmatmul.mubr.msk.f32.gmra.mrb[10].mxu0 %vm112_vm1, %v26_v17 }
  0x18   :  { %477 = vmatprep.mubr.msk.f32.mxu0 %vm558_vm2, %v557_v0 }
  0x19   :  { %99 = vperm.xlu0 %549, %v44_v19   ;;  %104 = vperm.xlu1 %550, %v45_v21  }
  0x1b   :  { %478 = vmatmul.mubr.msk.f32.gmra.mrb[12].mxu0 %vm112_vm1, %v27_v20 }
  0x1c   :  { %480 = vmatprep.mubr.msk.f32.mxu0 %vm558_vm2, %v557_v0 }
  0x1d   :  { %109 = vperm.xlu0 %549, %v46_v22   ;;  %303 = vperm.xlu1 %550, %v300_v24  }
  0x1f   :  { %481 = vmatmul.mubr.msk.f32.gmra.mrb[14].mxu0 %vm112_vm1, %v28_v23 }
  0x20   :  { %483 = vmatprep.mubr.msk.f32.mxu0 %vm558_vm2, %v557_v0 }
  0x23   :  { %484 = vmatmul.mubr.msk.f32.gmra.mrb[16].mxu0 %vm112_vm1, %v29_v25 }
  0x24   :  { %486 = vmatprep.mubr.msk.f32.mxu0 %vm558_vm2, %v557_v0 }
  0x27   :  { %487 = vmatmul.mubr.msk.f32.gmra.mrb[18].mxu0 %vm112_vm1, %v30_v26 }
  0x28   :  { %489 = vmatprep.mubr.msk.f32.mxu0 %vm558_vm2, %v557_v0 }
  0x2b   :  { %490 = vmatmul.mubr.msk.f32.gmra.mrb[20].mxu0 %vm112_vm1, %v31_v27 }
  0x2c   :  { %492 = vmatprep.mubr.msk.f32.mxu0 %vm558_vm2, %v557_v0 }
  0x2f   :  { %493 = vmatmul.mubr.msk.f32.gmra.mrb[22].mxu0 %vm112_vm1, %v32_v28 }
  0x30   :  { %495 = vmatprep.mubr.msk.f32.mxu0 %vm558_vm2, %v557_v0 }
  0x33   :  { %496 = vmatmul.mubr.msk.f32.gmra.mrb[24].mxu0 %vm112_vm1, %v33_v29 }
  0x84   :  { %v50_v31 = vpop.permute.xlu0 %49  ;;  %v60_v39 = vpop.permute.xlu1 %59 }
  0x88   :  { %v55_v35 = vpop.permute.xlu0 %54  ;;  %v65_v46 = vpop.permute.xlu1 %64 }
  0x8c   :  { %v70_v55 = vpop.permute.xlu0 %69  ;;  %v75_v57 = vpop.permute.xlu1 %74 }
  0x90   :  { %v80_v3 = vpop.permute.xlu0 %79  ;;  %v85_v5 = vpop.permute.xlu1 %84 }
  0x94   :  { %v90_v14 = vpop.permute.xlu0 %89  ;;  %v95_v16 = vpop.permute.xlu1 %94 }
  0x98   :  { %v100_v25 = vpop.permute.xlu0 %99  ;;  %v105_v27 = vpop.permute.xlu1 %104 }
  0xd6   :  { %v222_v32 = vpop.f32.mrb[0].mxu0 }
  0xd7   :  { %v461_v33 = vpop.f32.mrb[1].mxu0  ;;  %v223_v34 = vadd.f32 %v222_v32, %v50_v31 }
  0xd9   :  { %v286_v40 = vmax.f32 %v223_v34, 0.0  ;;  %v110_v34 = vpop.permute.xlu0 %109 }
  0xda   :  { %v227_v36 = vpop.f32.mrb[2].mxu0 }
  0xdb   :  { %v228_v37 = vadd.f32 %v227_v36, %v55_v35  ;;  %v464_v38 = vpop.f32.mrb[3].mxu0 }
  0xdd   :  { %v287_v41 = vmax.f32 %v228_v37, 0.0 }
  0xde   :  { %v232_v42 = vpop.f32.mrb[4].mxu0 }
  0xdf   :  { %v467_v43 = vpop.f32.mrb[5].mxu0  ;;  %v528_v44 = vpack.c.bf16 %v287_v41, %v286_v40  ;;  %v233_v45 = vadd.f32 %v232_v42, %v60_v39  ;;  %v299_v40 = vld [vmem:[%s734_s3] sm:$0x3] }
  0xe1   :  { %529 = vmatpush3.bf16.msra.mxu1 %v528_v44  ;;  %v288_v50 = vmax.f32 %v233_v45, 0.0 }
  0xe2   :  { %v237_v47 = vpop.f32.mrb[6].mxu0  ;;  %530 = vmatprep.subr.bf16.mxu1 %v560_v30 }
  0xe3   :  { %v238_v48 = vadd.f32 %v237_v47, %v65_v46  ;;  %v470_v49 = vpop.f32.mrb[7].mxu0 }
  0xe4   :  { %v384_v49 = vlaneseq }
  0xe5   :  { %v289_v51 = vmax.f32 %v238_v48, 0.0 }
  0xe6   :  { %v242_v52 = vpop.f32.mrb[8].mxu0 }
  0xe7   :  { %v531_v53 = vpack.c.bf16 %v289_v51, %v288_v50  ;;  %v473_v54 = vpop.f32.mrb[9].mxu0  ;;  %v243_v56 = vadd.f32 %v242_v52, %v70_v55 }
  0xe9   :  { %532 = vmatpush3.bf16.msra.mxu1 %v531_v53  ;;  %v290_v61 = vmax.f32 %v243_v56, 0.0  ;;  %v385_v53 = vshrl.u32 %v384_v49, 7 }
  0xea   :  { %v247_v58 = vpop.f32.mrb[10].mxu0  ;;  %533 = vmatprep.subr.bf16.mxu1 %v560_v30 }
  0xeb   :  { %v248_v59 = vadd.f32 %v247_v58, %v75_v57  ;;  %v476_v60 = vpop.f32.mrb[11].mxu0  ;;  %vm386_vm6 = vcmp.eq.s32.totalorder %v385_v53, 0 }
  0xed   :  { %v291_v62 = vmax.f32 %v248_v59, 0.0 }
  0xee   :  { %v252_v63 = vpop.f32.mrb[12].mxu0 }
  0xef   :  { %v534_v1 = vpack.c.bf16 %v291_v62, %v290_v61  ;;  %v479_v2 = vpop.f32.mrb[13].mxu0  ;;  %v253_v4 = vadd.f32 %v252_v63, %v80_v3 }
  0xf1   :  { %535 = vmatpush3.bf16.msra.mxu1 %v534_v1  ;;  %v292_v9 = vmax.f32 %v253_v4, 0.0 }
  0xf2   :  { %v257_v6 = vpop.f32.mrb[14].mxu0  ;;  %536 = vmatprep.subr.bf16.mxu1 %v560_v30 }
  0xf3   :  { %v258_v7 = vadd.f32 %v257_v6, %v85_v5  ;;  %v482_v8 = vpop.f32.mrb[15].mxu0 }
  0xf5   :  { %v293_v10 = vmax.f32 %v258_v7, 0.0 }
  0xf6   :  { %v262_v11 = vpop.f32.mrb[16].mxu0 }
  0xf7   :  { %v537_v12 = vpack.c.bf16 %v293_v10, %v292_v9  ;;  %v485_v13 = vpop.f32.mrb[17].mxu0  ;;  %v263_v15 = vadd.f32 %v262_v11, %v90_v14 }
  0xf9   :  { %538 = vmatpush3.bf16.msra.mxu1 %v537_v12  ;;  %v294_v20 = vmax.f32 %v263_v15, 0.0 }
  0xfa   :  { %v267_v17 = vpop.f32.mrb[18].mxu0  ;;  %539 = vmatprep.subr.bf16.mxu1 %v560_v30 }
  0xfb   :  { %v268_v18 = vadd.f32 %v267_v17, %v95_v16  ;;  %v488_v19 = vpop.f32.mrb[19].mxu0 }
  0xfd   :  { %v295_v21 = vmax.f32 %v268_v18, 0.0 }
  0xfe   :  { %v272_v22 = vpop.f32.mrb[20].mxu0 }
  0xff   :  { %v540_v23 = vpack.c.bf16 %v295_v21, %v294_v20  ;;  %v491_v24 = vpop.f32.mrb[21].mxu0  ;;  %v273_v26 = vadd.f32 %v272_v22, %v100_v25 }
 0x101   :  { %541 = vmatpush3.bf16.msra.mxu1 %v540_v23  ;;  %v296_v32 = vmax.f32 %v273_v26, 0.0 }
 0x102   :  { %v277_v28 = vpop.f32.mrb[22].mxu0  ;;  %542 = vmatprep.subr.bf16.mxu1 %v560_v30  ;;  %v304_v30 = vpop.permute.xlu1 %303 }
 0x103   :  { %v278_v29 = vadd.f32 %v277_v28, %v105_v27  ;;  %v494_v31 = vpop.f32.mrb[23].mxu0 }
 0x105   :  { %v297_v33 = vmax.f32 %v278_v29, 0.0 }
 0x106   :  { %v282_v35 = vpop.f32.mrb[24].mxu0 }
 0x107   :  { %v543_v36 = vpack.c.bf16 %v297_v33, %v296_v32  ;;  %v283_v37 = vadd.f32 %v282_v35, %v110_v34  ;;  %v497_v38 = vpop.f32.mrb[25].mxu0 }
 0x109   :  { %544 = vmatpush3.bf16.msra.mxu1 %v543_v36  ;;  %v298_v39 = vmax.f32 %v283_v37, 0.0 }
 0x10a   :  { %522 = vmatprep.subr.mxu1 %v557_v0 }
 0x10d   :  { %523 = vmatpush3.msk.msra.mxu1 %vm310_vm3, %v298_v39 }
 0x10e   :  { %525 = vmatmul.mubr.msk.f32.vlgmr.msra.gmra.mrb[0].mxu1 %vm306_vm4, %v299_v40 }
 0x1e1   :  { %v380_v41 = vpop.f32.mrb[0].mxu1 }
 0x1e2   :  { %v381_v42 = vadd.f32 %v380_v41, %v304_v30  ;;  %v526_v43 = vpop.f32.mrb[1].mxu1 }
 0x1e4   :  { %v392_v44 = vand.u32 2147483647, %v381_v42  ;;  %v389_v57 = vmax.f32 %v381_v42, 0.0  ;;  %vm390_vm7 = vcmp.ne.f32.partialorder %v381_v42, %v381_v42 }
 0x1e6   :  { %v393_v45 = vsub.f32 0.0, %v392_v44 }
 0x1e8   :  { %v394_v46 = vmul.f32 1.442695, %v393_v45 }
 0x1ea   :  { %551 = vpow2.f32 %v394_v46 }
 0x1f4   :  { %v552_v47 = vpop.eup %551 }
 0x1f5   :  { %v396_v48 = vadd.f32 1.0, %v552_v47  ;;  %v399_v0 = vmul.f32 -0.5, %v552_v47  ;;  %v402_v51 = vand.u32 2147483647, %v552_v47 }
 0x1f7   :  { %553 = vlog2.f32 %v396_v48  ;;  %v400_v50 = vadd.f32 1.0, %v399_v0  ;;  %vm403_vm5 = vcmp.lt.f32.partialorder %v402_v51, 0.0004427343 }
 0x1f8   :  { %555 = vtanh.f32 %v381_v42 }
 0x1f9   :  { %v401_v55 = vmul.f32 %v552_v47, %v400_v50 }
 0x201   :  { %v554_v52 = vpop.eup %553 }
 0x202   :  { %v398_v54 = vmul.f32 0.6931472, %v554_v52  ;;  %v556_v56 = vpop.eup %555 }
 0x203   :  { %v388_v60 = vmul.f32 2.0, %v556_v56 }
 0x204   :  { %v404_v58 = vsel %vm403_vm5, %v401_v55, %v398_v54 }
 0x205   :  { %v405_v59 = vadd.f32 %v404_v58, %v389_v57 }
 0x207   :  { %v406_v61 = vsel %vm390_vm7, %v381_v42, %v405_v59 }
 0x208   :  { %v407_v62 = vsel %vm386_vm6, %v388_v60, %v406_v61 }
 0x209   :  { %408 = vst [vmem:[%s735_s5] sm:$0x3] %v407_v62 }

</bundles_post_ra>
